<compile_context>
chip_gen: v7x
topology: tpu7x:2x2x1
jax: 0.10.0
libtpu: 0.0.40
codegen_flags: <defaults>
</compile_context>

<pallas_src>
import math

import jax
import jax.numpy as jnp
from jax.experimental import pallas as pl
from jax.experimental.pallas import tpu as pltpu


def _round_up(n, m):
    return ((n + m - 1) // m) * m


# ---------------------------------------------------------------------------
# Kernel 1 (hot path): out = x + clip(e, -eps, eps), e broadcast over batch.
# Pure streaming elementwise add; eps = +inf gives the un-clamped forward add.
# ---------------------------------------------------------------------------
def _add_clip_kernel(x_ref, e_ref, eps_ref, o_ref):
    eps = eps_ref[0]                                   # scalar from SMEM
    o_ref[...] = x_ref[...] + jnp.clip(e_ref[...], -eps, eps)


def uap_perturb(x, e, eps=None, *, vmem_block_budget_bytes=8 * 1024 * 1024):
    """x: [B, C, H, W], e: [1, C, H, W] -> x + clip(e, -eps, eps).

    eps=None means no clamp (exact UAP_Model.forward semantics: x + e).
    The arrays are flattened to a lane-dense [B, N] layout and tiled along the
    lane axis with blocks sized against a VMEM budget (double-buffer aware),
    conservative enough for v5e (16 MiB scoped default) and v7x (64 MiB VMEM).
    """
    B = x.shape[0]
    assert e.shape == (1,) + x.shape[1:], (x.shape, e.shape)
    N = math.prod(x.shape[1:])
    itemsize = jnp.dtype(x.dtype).itemsize

    # Lane tile: (x block + out block) are B rows each, e block is 1 row,
    # each double-buffered by the pipeline -> bytes per lane-column:
    per_lane = (2 * B + 1) * itemsize * 2
    tn = max(128, (vmem_block_budget_bytes // per_lane) // 128 * 128)
    tn = min(tn, _round_up(N, 128))
    n_pad = _round_up(N, tn)

    x2 = x.reshape(B, N)
    e2 = e.reshape(1, N)
    if n_pad != N:
        x2 = jnp.pad(x2, ((0, 0), (0, n_pad - N)))
        e2 = jnp.pad(e2, ((0, 0), (0, n_pad - N)))

    eps_val = jnp.inf if eps is None else eps
    eps_arr = jnp.full((1,), eps_val, dtype=x.dtype)

    grid = (n_pad // tn,)
    out2 = pl.pallas_call(
        _add_clip_kernel,
        out_shape=jax.ShapeDtypeStruct((B, n_pad), x.dtype),
        grid=grid,
        in_specs=[
            # full batch per block; lane axis tiled in multiples of 128
            pl.BlockSpec((B, tn), lambda j: (0, j)),
            # shared perturbation tile (broadcast over batch inside the kernel)
            pl.BlockSpec((1, tn), lambda j: (0, j)),
            # eps scalar lives in SMEM -> reusable kernel, no recompiles
            pl.BlockSpec(memory_space=pltpu.SMEM),
        ],
        out_specs=pl.BlockSpec((B, tn), lambda j: (0, j)),
        compiler_params=pltpu.CompilerParams(
            dimension_semantics=("parallel",),   # megacore-shardable on v7x
        ),
    )(x2, e2, eps_arr)

    if n_pad != N:
        out2 = out2[:, :N]
    return out2.reshape(x.shape)


def uap_add(x, e):
    """Exact UAP_Model.forward compute: x + e (broadcast over batch)."""
    return uap_perturb(x, e, eps=None)


# ---------------------------------------------------------------------------
# Kernel 2: update_e  ->  e = clamp(e, -eps, eps)  (in-place-style)
# ---------------------------------------------------------------------------
def _clip_kernel(e_ref, eps_ref, o_ref):
    eps = eps_ref[0]
    o_ref[...] = jnp.clip(e_ref[...], -eps, eps)


def uap_update_e(e, eps):
    """Clamp the perturbation parameter. Lane-dense (8, n/8) layout; the input
    is aliased to the output (matches PyTorch's in-place e update)."""
    shape, dtype = e.shape, e.dtype
    N = math.prod(shape)
    n_pad = _round_up(N, 8 * 128)           # dense (8, multiple-of-128) slab
    cols = n_pad // 8

    e2 = e.reshape(1, N)
    if n_pad != N:
        e2 = jnp.pad(e2, ((0, 0), (0, n_pad - N)))
    e2 = e2.reshape(8, cols)

    eps_arr = jnp.full((1,), eps, dtype=dtype)
    out2 = pl.pallas_call(
        _clip_kernel,
        out_shape=jax.ShapeDtypeStruct((8, cols), dtype),
        in_specs=[
            pl.BlockSpec(memory_space=pltpu.VMEM),   # whole (small) parameter
            pl.BlockSpec(memory_space=pltpu.SMEM),   # eps scalar
        ],
        out_specs=pl.BlockSpec(memory_space=pltpu.VMEM),
        input_output_aliases={0: 0},                 # clamp in place
    )(e2, eps_arr)
    return out2.reshape(1, n_pad)[:, :N].reshape(shape)


# ---------------------------------------------------------------------------
# Forward wrapper (mirrors UAP_Model.forward).  The original forward does not
# return `output`; we return it here so the result can be materialized.
# If eps is given, the clamp is fused into the add (what a PGD loop would use
# right after update_e) — one HBM pass instead of two kernels.
# ---------------------------------------------------------------------------
# TODO(synk): `model` is an arbitrary external nn.Module passed at call time;
#             it cannot be translated generically (a deterministic linear
#             surrogate head is used in the demo).  Ideally the perturb-add
#             would be fused into the model's first layer to avoid writing the
#             perturbed activations to HBM and immediately re-reading them.
def uap_forward(model_fn, x, e, eps=None):
    perturbed = uap_perturb(x, e, eps=eps)   # Pallas elementwise hot path
    return model_fn(perturbed)               # external model (plain JAX glue)


if __name__ == "__main__":
    key = jax.random.PRNGKey(0)
    k_x, k_e, k_w = jax.random.split(key, 3)

    B, C, H, W = 2, 4, 16, 16
    NUM_CLASSES = 8
    EPS = 0.03

    x = jax.random.normal(k_x, (B, C, H, W), dtype=jnp.float32)
    # deterministic "learned" perturbation parameter e (role of nn.Parameter)
    e = 0.05 * jax.random.normal(k_e, (1, C, H, W), dtype=jnp.float32)
    # deterministic surrogate classifier: flatten -> linear
    w = jax.random.normal(k_w, (C * H * W, NUM_CLASSES), dtype=jnp.float32) * 0.01

    def model_fn(inp):
        return jnp.dot(inp.reshape(inp.shape[0], -1), w)

    # plain-JAX references (computed up front, before any aliased kernel runs)
    ref_e = jnp.clip(e, -EPS, EPS)
    ref_plain = x + e
    ref_perturbed = x + ref_e
    ref_out = model_fn(ref_perturbed)
    jax.block_until_ready((ref_e, ref_plain, ref_perturbed, ref_out))

    # 1) exact forward semantics: x + e (no clamp)
    perturbed_plain = uap_add(x, e)
    jax.block_until_ready(perturbed_plain)
    assert jnp.allclose(perturbed_plain, ref_plain, atol=1e-6), "add mismatch"

    # 2) update_e clamp kernel
    e_clamped = uap_update_e(e, EPS)
    jax.block_until_ready(e_clamped)
    assert jnp.allclose(e_clamped, ref_e, atol=1e-6), "clamp mismatch"

    # 3) fused clamp+add forward (update_e + forward in a single HBM pass)
    out_fused = uap_forward(model_fn, x, e, eps=EPS)
    jax.block_until_ready(out_fused)
    assert jnp.allclose(out_fused, ref_out, atol=1e-5), "fused forward mismatch"

    # 4) forward with the explicitly clamped parameter matches as well
    out = uap_forward(model_fn, x, e_clamped)
    jax.block_until_ready(out)
    assert jnp.allclose(out, ref_out, atol=1e-5), "forward mismatch"

    print("KERNEL_OK")
</pallas_src>

<mosaic_0001>
module attributes {stable_mosaic.version = 11 : i64} {
  func.func @_add_clip_kernel(%arg0: i32, %arg1: memref<2x1024xf32, #tpu.memory_space<vmem>>, %arg2: memref<1x1024xf32, #tpu.memory_space<vmem>>, %arg3: memref<1xf32, #tpu.memory_space<smem>>, %arg4: memref<2x1024xf32, #tpu.memory_space<vmem>>) attributes {dimension_semantics = [#tpu.dimension_semantics<parallel>], iteration_bounds = array<i64: 1>, scalar_prefetch = 0 : i64, scratch_operands = 0 : i64, tpu.core_type = #tpu.core_type<tc>, window_params = [{transform_indices = @transform_0, window_bounds = array<i64: 2, 1024>}, {transform_indices = @transform_1, window_bounds = array<i64: 1, 1024>}, {transform_indices = @transform_2, window_bounds = array<i64: 1>}, {transform_indices = @transform_3, window_bounds = array<i64: 2, 1024>}]} {
    %c0 = arith.constant 0 : index
    %0 = memref.load %arg3[%c0] : memref<1xf32, #tpu.memory_space<smem>>
    %c0_0 = arith.constant 0 : index
    %c0_1 = arith.constant 0 : index
    %1 = vector.load %arg1[%c0_0, %c0_1] : memref<2x1024xf32, #tpu.memory_space<vmem>>, vector<2x1024xf32>
    %c0_2 = arith.constant 0 : index
    %c0_3 = arith.constant 0 : index
    %2 = vector.load %arg2[%c0_2, %c0_3] : memref<1x1024xf32, #tpu.memory_space<vmem>>, vector<1x1024xf32>
    %cst = arith.constant 0.000000e+00 : f32
    %3 = arith.subf %cst, %0 : f32
    %4 = vector.broadcast %3 : f32 to vector<1x1024xf32>
    %5 = arith.maximumf %4, %2 : vector<1x1024xf32>
    %6 = vector.broadcast %0 : f32 to vector<1x1024xf32>
    %7 = arith.minimumf %6, %5 : vector<1x1024xf32>
    %8 = vector.broadcast %7 : vector<1x1024xf32> to vector<2x1024xf32>
    %9 = arith.addf %1, %8 : vector<2x1024xf32>
    %c0_4 = arith.constant 0 : index
    %c0_5 = arith.constant 0 : index
    %10 = vector.load %arg4[%c0_4, %c0_5] : memref<2x1024xf32, #tpu.memory_space<vmem>>, vector<2x1024xf32>
    tpu.vector_store %arg4[%c0_4, %c0_5], %9 {strides = array<i32>} : memref<2x1024xf32, #tpu.memory_space<vmem>>, vector<2x1024xf32>,
    return
  }
  func.func @transform_0(%arg0: i32) -> (i32, i32) {
    %c0_i32 = arith.constant 0 : i32
    %c0_i32_0 = arith.constant 0 : i32
    return %c0_i32, %arg0 : i32, i32
  }
  func.func @transform_1(%arg0: i32) -> (i32, i32) {
    %c0_i32 = arith.constant 0 : i32
    %c0_i32_0 = arith.constant 0 : i32
    return %c0_i32, %arg0 : i32, i32
  }
  func.func @transform_2(%arg0: i32) -> i32 {
    %c0_i32 = arith.constant 0 : i32
    %c0_i32_0 = arith.constant 0 : i32
    return %c0_i32 : i32
  }
  func.func @transform_3(%arg0: i32) -> (i32, i32) {
    %c0_i32 = arith.constant 0 : i32
    %c0_i32_0 = arith.constant 0 : i32
    return %c0_i32, %arg0 : i32, i32
  }
}

</mosaic_0001>

<bundles_post_ra>
// kernel: tpu_custom_call.1
= control target key start
LH: loop header
LB: loop body
LE: loop exit
PB: predicated region body
PF: predicated region fallthrough
CT: control target
= control target key end

     0   :  { %9 = vsyncpa [#allocation4], 0  ;;  %s280_s0 = inlined_call_operand.hbm [shape: f32[2,1024], index: 0, kind: input, shape index: {}]   ;;  %s281_s1 = inlined_call_operand.hbm [shape: f32[1,1024], index: 1, kind: input, shape index: {}]   ;;  %s282_s2 = inlined_call_operand.<no memory space> [shape: f32[1], index: 2, kind: input, shape index: {}]   ;;  %s283_s3 = inlined_call_operand.hbm [shape: f32[2,1024], index: 3, kind: output, shape index: {}]  }
   0x1   :  { %10 = vsyncpa [#allocation7], 0 }
   0x2   :  { %11 = vsyncpa [#allocation5], 0  ;;  %s214_s12 = smov [#allocation3]   ;;  %s215_s14 = smov [#allocation6]  }
   0x3   :  { %s18_s13 = sshll.u32 %s214_s12, 4  ;;  %s28_s15 = sshll.u32 %s215_s14, 4  ;;  %s19_s13 = int_to_ptr.vmem [resolvable:$true] %s18_s13  ;;  %s29_s15 = int_to_ptr.vmem [resolvable:$true] %s28_s15 }
   0x4   :  { %s142_s18 = scalar_lea.hbm %s280_s0, 256 }
   0x5   :  { %p143_p0 = scmp.ne.s32.totalorder %s280_s0, %s142_s18  ;;  %p146_p1 = scmp.lt.u32.totalorder %s142_s18, %s280_s0 }
   0x7   :  { %p148_p2 = pnand %p146_p1, %p143_p0 }
   0x9   :  { %151 = shalt.err (!%p148_p2)
}
   0xa   :  { %s152_s23 = scalar_lea.vmem %s19_s13, 256  ;;  %p157_p4 = scmp.lt.s32.totalorder %s19_s13, %s19_s13 }
   0xb   :  { %p153_p3 = scmp.ne.s32.totalorder %s19_s13, %s152_s23  ;;  %p158_p5 = scmp.lt.s32.totalorder %s152_s23, %s152_s23 }
   0xd   :  { %p159_p6 = por %p158_p5, %p157_p4 }
   0xf   :  { %p160_p7 = pnand %p159_p6, %p153_p3 }
  0x11   :  { %163 = shalt.err (!%p160_p7)
}
  0x12   :  { %21 = dma.hbm_to_vmem [thread:$0]  %s280_s0, 256, %s19_s13, [#allocation4]  }
  0x13   :  { %s164_s28 = scalar_lea.hbm %s281_s1, 128 }
  0x14   :  { %p165_p8 = scmp.ne.s32.totalorder %s281_s1, %s164_s28  ;;  %p168_p9 = scmp.lt.u32.totalorder %s164_s28, %s281_s1 }
  0x16   :  { %p170_p10 = pnand %p168_p9, %p165_p8 }
  0x18   :  { %173 = shalt.err (!%p170_p10)
}
  0x19   :  { %s174_s6 = scalar_lea.vmem %s29_s15, 128  ;;  %p179_p12 = scmp.lt.s32.totalorder %s29_s15, %s29_s15 }
  0x1a   :  { %p175_p11 = scmp.ne.s32.totalorder %s29_s15, %s174_s6  ;;  %p180_p13 = scmp.lt.s32.totalorder %s174_s6, %s174_s6 }
  0x1c   :  { %p181_p0 = por %p180_p13, %p179_p12 }
  0x1e   :  { %p182_p1 = pnand %p181_p0, %p175_p11 }
  0x20   :  { %185 = shalt.err (!%p182_p1)
}
  0x21   :  { %31 = dma.hbm_to_vmem [thread:$0]  %s281_s1, 128, %s29_s15, [#allocation7]  }
  0x22   :  { %208 = dma.done.wait [#allocation4], 256  }
  0x23   :  { %209 = vsyncadd [#allocation4], 4294967040 }
  0x24   :  { %210 = dma.done.wait [#allocation7], 128  }
  0x25   :  { %211 = vsyncadd [#allocation7], 4294967168  ;;  %v50_v0 = vlaneseq  ;;  %s44_s10 = ssub.f32 0.0, %s282_s2  ;;  %v216_v2 = vmov 1983009808   ;;  %v43_v5 = vld [vmem:[#allocation6] sm:$0xff]  ;;  %v47_v6 = vstv %s282_s2 }
  0x26   :  { %v85_v3 = vunpack.c.l.s4 %v216_v2  ;;  %v41_v33 = vld [vmem:[#allocation3] sm:$0xff]  ;;  %v42_v37 = vld [vmem:[#allocation3 + $0x8] sm:$0xff]  ;;  %s217_s1 = smov [#allocation8]  }
  0x27   :  { %v51_v1 = vshrl.u32 %v50_v0, 7  ;;  %v45_v4 = vstv %s44_s10  ;;  %s128_s2 = sshll.u32 %s217_s1, 4  ;;  %s129_s2 = int_to_ptr.vmem [resolvable:$true] %s128_s2 }
  0x28   :  { %v86_v8 = vunpack.c.0.s8 %v85_v3  ;;  %v46_v9 = vmax.f32 %v45_v4, %v43_v5  ;;  %s186_s13 = scalar_lea.vmem %s129_s2, 256  ;;  %p191_p3 = scmp.lt.s32.totalorder %s129_s2, %s129_s2 }
  0x29   :  { %v52_v7 = vsub.s32 0, %v51_v1  ;;  %v56_v10 = vsub.s32 1, %v51_v1  ;;  %v60_v11 = vsub.s32 2, %v51_v1  ;;  %v64_v12 = vsub.s32 3, %v51_v1  ;;  %p187_p2 = scmp.ne.s32.totalorder %s129_s2, %s186_s13  ;;  %p192_p4 = scmp.lt.s32.totalorder %s186_s13, %s186_s13 }
  0x2a   :  { %v68_v13 = vsub.s32 4, %v51_v1  ;;  %v72_v14 = vsub.s32 5, %v51_v1  ;;  %v76_v15 = vsub.s32 6, %v51_v1  ;;  %v80_v16 = vsub.s32 7, %v51_v1 }
  0x2b   :  { %v48_v17 = vmin.f32 %v47_v6, %v46_v9  ;;  %v89_v18 = vsub.s32 %v86_v8, %v51_v1  ;;  %p193_p5 = por %p192_p4, %p191_p3 }
  0x2d   :  { %v53_v19 = vrot.slane %v48_v17, %v52_v7  ;;  %v57_v20 = vrot.slane %v48_v17, %v56_v10  ;;  %v61_v21 = vrot.slane %v48_v17, %v60_v11  ;;  %v65_v22 = vrot.slane %v48_v17, %v64_v12  ;;  %p194_p6 = pnand %p193_p5, %p187_p2 }
  0x2e   :  { %v69_v23 = vrot.slane %v48_v17, %v68_v13  ;;  %v73_v24 = vrot.slane %v48_v17, %v72_v14  ;;  %v77_v25 = vrot.slane %v48_v17, %v76_v15  ;;  %v81_v26 = vrot.slane %v48_v17, %v80_v16 }
  0x2f   :  { %v82_v27 = vcombine.low %v53_v19, %v57_v20  ;;  %v83_v28 = vcombine.low %v61_v21, %v65_v22 }
  0x30   :  { %v99_v29 = vcombine.low %v69_v23, %v73_v24  ;;  %v100_v30 = vcombine.low %v77_v25, %v81_v26 }
  0x31   :  { %v90_v31 = vrot.slane %v82_v27, %v89_v18  ;;  %v97_v32 = vrot.slane %v83_v28, %v89_v18 }
  0x32   :  { %v107_v34 = vrot.slane %v99_v29, %v89_v18  ;;  %v114_v35 = vrot.slane %v100_v30, %v89_v18 }
  0x33   :  { %v98_v36 = vcombine.low %v90_v31, %v97_v32 }
  0x34   :  { %v115_v38 = vcombine.low %v107_v34, %v114_v35 }
  0x35   :  { %v118_v39 = vadd.f32 %v98_v36, %v41_v33 }
  0x36   :  { %v119_v40 = vadd.f32 %v115_v38, %v42_v37 }
  0x37   :  { %120 = vst [vmem:[#allocation8] sm:$0xff] %v118_v39 }
  0x38   :  { %121 = vst [vmem:[#allocation8 + $0x8] sm:$0xff] %v119_v40 }
  0x39   :  { %197 = shalt.err (!%p194_p6)
}
  0x3a   :  { %s198_s16 = scalar_lea.hbm %s283_s3, 256 }
  0x3b   :  { %p199_p7 = scmp.ne.s32.totalorder %s283_s3, %s198_s16  ;;  %p202_p8 = scmp.lt.u32.totalorder %s198_s16, %s283_s3 }
  0x3d   :  { %p204_p9 = pnand %p202_p8, %p199_p7 }
  0x3f   :  { %207 = shalt.err (!%p204_p9)
}
  0x40   :  { %131 = dma.vmem_to_hbm [thread:$0]  %s129_s2, 256, %s283_s3, [#allocation5]  }
  0x41   :  { %212 = dma.done.wait [#allocation5], 256  }
  0x42   :  { %213 = vsyncadd [#allocation5], 4294967040 }
  0x43   :  { %135 = vsyncpa [#allocation4], 1 }
  0x44   :  { %136 = vsyncpa [#allocation7], 1 }
  0x45   :  { %137 = vsyncpa [#allocation5], 1 }

</bundles_post_ra>
